<compile_context>
chip_gen: v5e
topology: v5e:2x2
jax: 0.10.0
libtpu: 0.0.40
codegen_flags: <defaults>
</compile_context>

<pallas_src>
import functools

import numpy as np
import jax
import jax.numpy as jnp
from jax.experimental import pallas as pl
from jax.experimental.pallas import tpu as pltpu

EPS = 1e-5                      # nn.LayerNorm default eps
INV_SQRT2 = 0.7071067811865476  # exact GELU uses erf(x / sqrt(2))
_POOL_SIZES = (1, 2, 3, 6)


# ----------------------------------------------------------------------------
# Pallas kernels: fused [x@Wx + bilinear(branches)@Wb -> LayerNorm2d -> GELU]
# ----------------------------------------------------------------------------
def _fused_kernel_plain(x_ref, u_ref, w_ref, g_ref, gam_ref, bet_ref, o_ref):
    # acc[p, :] = x[p, :] @ Wx + U[p, :] @ G_n   (per-pixel 1x1 conv over concat)
    acc = jnp.dot(x_ref[...], w_ref[...], preferred_element_type=jnp.float32)
    acc = acc + jnp.dot(u_ref[...], g_ref[...], preferred_element_type=jnp.float32)
    # LayerNorm2d over channels (last axis), biased variance, eps = 1e-5.
    mean = jnp.mean(acc, axis=-1, keepdims=True)
    cen = acc - mean
    var = jnp.mean(cen * cen, axis=-1, keepdims=True)
    y = cen * jax.lax.rsqrt(var + EPS) * gam_ref[...] + bet_ref[...]
    # Exact (erf-based) GELU, matching nn.GELU() default.
    o_ref[...] = 0.5 * y * (1.0 + jax.lax.erf(y * INV_SQRT2))


def _fused_kernel_packed(x_ref, u_ref, w_ref, g_ref, m_ref, gam_ref, bet_ref, o_ref):
    # Lane-packed variant: each row holds P pixels; weights are block-diagonal, so
    # the math is identical to the plain variant but all 128 lanes stay live
    # (dense VPU work and unmasked stores even for narrow Cout).
    acc = jnp.dot(x_ref[...], w_ref[...], preferred_element_type=jnp.float32)
    acc = acc + jnp.dot(u_ref[...], g_ref[...], preferred_element_type=jnp.float32)
    # Per-pixel LayerNorm stats via a block-diagonal averaging matmul on the MXU.
    mean = jnp.dot(acc, m_ref[...], preferred_element_type=jnp.float32)
    cen = acc - mean
    var = jnp.dot(cen * cen, m_ref[...], preferred_element_type=jnp.float32)
    y = cen * jax.lax.rsqrt(var + EPS) * gam_ref[...] + bet_ref[...]
    o_ref[...] = 0.5 * y * (1.0 + jax.lax.erf(y * INV_SQRT2))


# ----------------------------------------------------------------------------
# Kernel wrapper
# ----------------------------------------------------------------------------
def _choose_tile(hw, n_batch, pack, row_bytes, fixed_bytes, budget=24 * 2**20):
    """Pixel rows per grid step: big (512-1024 target) but within a VMEM budget."""
    unit = 8 * pack                       # keeps packed row tiles sublane-aligned
    tile = 1024
    while tile > unit and (2 * tile * row_bytes + 2 * fixed_bytes) > budget:
        tile //= 2
    if n_batch == 1:                      # keep >= 2 grid steps for v7x's 2 TCs
        tile = min(tile, max(unit, hw // 2))
    tile = min(tile, max(unit, hw))
    tile = max(unit, (tile // unit) * unit)
    return tile


def fused_out_stage(x_nhwc, u_pix, g_branch, wx, gamma, beta,
                    *, compute_dtype=jnp.bfloat16):
    """Fused [concat -> 1x1 out-conv -> LayerNorm2d -> GELU] stage.

    x_nhwc:   (N, H, W, C)   input feature map
    u_pix:    (H*W, S)       per-pixel bilinear weights over all pyramid cells (S=50)
    g_branch: (N, S, Cout)   pooled branch features with the out-conv weight folded in
    wx:       (C, Cout)      out-conv weight block acting on x itself
    """
    N, H, W, C = x_nhwc.shape
    HW = H * W
    S = u_pix.shape[1]
    Co = wx.shape[1]

    # Pack P pixels per 128-lane row when Cout is narrow (lane-dense path).
    P = 128 // Co if (Co < 128 and 128 % Co == 0) else 1

    itemsize = jnp.dtype(compute_dtype).itemsize
    row_bytes = C * itemsize + S * itemsize + Co * 4          # streamed bytes / pixel
    fixed_bytes = ((P * C + P * S) * (P * Co) * itemsize      # W_bd + G_bd block
                   + (P * Co) ** 2 * 4 + 8 * P * Co)          # stats matrix + gamma/beta
    tile = _choose_tile(HW, N, P, row_bytes, fixed_bytes)
    hwp = ((HW + tile - 1) // tile) * tile                    # padded pixel count
    n_tiles = hwp // tile
    R, D_in, D_u, D_out = tile // P, P * C, P * S, P * Co

    # --- wrapper-side packing: pure HBM reshapes + tiny block-diagonal weights ---
    x_flat = x_nhwc.reshape(N, HW, C)
    u = jnp.asarray(u_pix, jnp.float32)
    if hwp != HW:
        x_flat = jnp.pad(x_flat, ((0, 0), (0, hwp - HW), (0, 0)))
        u = jnp.pad(u, ((0, hwp - HW), (0, 0)))
    xp = x_flat.reshape(N, hwp // P, D_in).astype(compute_dtype)
    up = u.reshape(hwp // P, D_u).astype(compute_dtype)

    eye_p = jnp.eye(P, dtype=jnp.float32)
    w_bd = jnp.einsum('pq,kc->pkqc', eye_p, wx).reshape(D_in, D_out).astype(compute_dtype)
    g_bd = jnp.einsum('pq,nsc->npsqc', eye_p, g_branch
                      ).reshape(N, D_u, D_out).astype(compute_dtype)
    gam = jnp.tile(gamma.astype(jnp.float32), P).reshape(1, D_out)
    bet = jnp.tile(beta.astype(jnp.float32), P).reshape(1, D_out)

    x_spec = pl.BlockSpec((None, R, D_in), lambda n, i: (n, i, 0))
    u_spec = pl.BlockSpec((R, D_u), lambda n, i: (i, 0))
    w_spec = pl.BlockSpec((D_in, D_out), lambda n, i: (0, 0))
    g_spec = pl.BlockSpec((None, D_u, D_out), lambda n, i: (n, 0, 0))
    v_spec = pl.BlockSpec((1, D_out), lambda n, i: (0, 0))
    o_spec = pl.BlockSpec((None, R, D_out), lambda n, i: (n, i, 0))

    if P > 1:
        # Block-diagonal per-pixel averaging matrix for the LayerNorm stats.
        m_stat = jnp.einsum('pq,ac->paqc', eye_p,
                            jnp.full((Co, Co), 1.0 / Co, jnp.float32)
                            ).reshape(D_out, D_out)
        kernel = _fused_kernel_packed
        in_specs = [x_spec, u_spec, w_spec, g_spec,
                    pl.BlockSpec((D_out, D_out), lambda n, i: (0, 0)),
                    v_spec, v_spec]
        args = (xp, up, w_bd, g_bd, m_stat, gam, bet)
    else:
        kernel = _fused_kernel_plain
        in_specs = [x_spec, u_spec, w_spec, g_spec, v_spec, v_spec]
        args = (xp, up, w_bd, g_bd, gam, bet)

    est = 2 * tile * row_bytes + 2 * fixed_bytes + (1 << 20)
    vmem_limit = int(min(48 * 2**20, max(2 * est, 32 * 2**20)))

    out = pl.pallas_call(
        kernel,
        out_shape=jax.ShapeDtypeStruct((N, hwp // P, D_out), jnp.float32),
        grid=(N, n_tiles),
        in_specs=in_specs,
        out_specs=o_spec,
        compiler_params=pltpu.CompilerParams(
            dimension_semantics=("parallel", "parallel"),
            vmem_limit_bytes=vmem_limit),
    )(*args)

    out = out.reshape(N, hwp, Co)[:, :HW, :]
    return out.reshape(N, H, W, Co)


# ----------------------------------------------------------------------------
# Plain-JAX glue: adaptive avg-pool, tiny branch ConvBnAct, bilinear weights
# ----------------------------------------------------------------------------
def _pool_bins(inp, out):
    return [(int(np.floor(i * inp / out)), int(np.ceil((i + 1) * inp / out)))
            for i in range(out)]


def adaptive_avg_pool_nhwc(x, s):
    """Exact nn.AdaptiveAvgPool2d semantics. x: (N,H,W,C) -> (N,s,s,C)."""
    rows = []
    for (h0, h1) in _pool_bins(x.shape[1], s):
        cols = [jnp.mean(x[:, h0:h1, w0:w1, :], axis=(1, 2))
                for (w0, w1) in _pool_bins(x.shape[2], s)]
        rows.append(jnp.stack(cols, axis=1))
    return jnp.stack(rows, axis=1)


def ln2d_channels_last(x, gamma, beta):
    mean = jnp.mean(x, axis=-1, keepdims=True)
    cen = x - mean
    var = jnp.mean(cen * cen, axis=-1, keepdims=True)
    return cen * jax.lax.rsqrt(var + EPS) * gamma + beta


def gelu_exact(x):
    return 0.5 * x * (1.0 + jax.lax.erf(x * INV_SQRT2))


def cba_1x1(x_nhwc, w, gamma, beta):
    """1x1 conv (no bias) + LayerNorm2d + exact GELU on a tiny pooled map."""
    y = jnp.einsum('nhwc,co->nhwo', x_nhwc, w, precision=jax.lax.Precision.HIGHEST)
    return gelu_exact(ln2d_channels_last(y, gamma, beta))


def bilinear_matrix(src, dst):
    """(dst, src) weights of F.interpolate(mode='bilinear', align_corners=True)."""
    M = np.zeros((dst, src), dtype=np.float32)
    if src == 1:
        M[:, 0] = 1.0
        return M
    scale = (src - 1) / (dst - 1) if dst > 1 else 0.0
    for d in range(dst):
        sc = d * scale
        s0 = int(np.floor(sc))
        s1 = min(s0 + 1, src - 1)
        t = sc - s0
        M[d, s0] += 1.0 - t
        M[d, s1] += t
    return M


@functools.lru_cache(maxsize=None)
def build_pixel_upsample_matrix(H, W, sizes=_POOL_SIZES):
    """(H*W, sum(s*s)) per-pixel bilinear weights over all pyramid source cells."""
    blocks = []
    for s in sizes:
        Uh = bilinear_matrix(s, H)                         # (H, s)
        Uw = bilinear_matrix(s, W)                         # (W, s)
        blocks.append(np.einsum('hs,wt->hwst', Uh, Uw).reshape(H * W, s * s))
    return np.concatenate(blocks, axis=1).astype(np.float32)


# ----------------------------------------------------------------------------
# Full PyramidPoolingModule forward
# ----------------------------------------------------------------------------
def pyramid_pooling_module(x_nchw, params, *, compute_dtype=jnp.bfloat16):
    """x_nchw: (N, C, H, W) -> (N, Cout, H, W)."""
    N, C, H, W = x_nchw.shape
    po = params["out"]
    Cout = po["wx"].shape[1]

    # TODO(synk): the tiny pooled-branch ConvBnActs (<=6x6 maps, negligible FLOPs)
    # and the NCHW<->NHWC transposes stay in plain JAX; drop the transposes if the
    # surrounding graph already uses NHWC.
    x = jnp.transpose(x_nchw, (0, 2, 3, 1)).astype(jnp.float32)  # NHWC

    # Low-rank branch fold: upsample(f_b) @ W_b == upsample(f_b @ W_b), so fold the
    # out-conv weight into the tiny pooled maps; the kernel does the bilinear
    # combine and the full-resolution branch maps never touch HBM.
    g_list = []
    for i, s in enumerate(_POOL_SIZES):
        pb = params["branches"][i]
        f = cba_1x1(adaptive_avg_pool_nhwc(x, s), pb["w"], pb["g"], pb["b"])
        w_out_b = po["w%d" % (i + 1)]
        g_list.append(jnp.einsum('nhwq,qo->nhwo', f, w_out_b,
                                 precision=jax.lax.Precision.HIGHEST
                                 ).reshape(N, s * s, Cout))
    g_branch = jnp.concatenate(g_list, axis=1)             # (N, 50, Cout)
    u_pix = build_pixel_upsample_matrix(H, W)               # (H*W, 50), numpy

    out_nhwc = fused_out_stage(x, u_pix, g_branch, po["wx"], po["g"], po["b"],
                               compute_dtype=compute_dtype)
    return jnp.transpose(out_nhwc, (0, 3, 1, 2))             # back to NCHW


# Pure-JAX f32 reference following the original concat formulation of the module.
def reference_ppm(x_nchw, params):
    N, C, H, W = x_nchw.shape
    po = params["out"]
    x = jnp.transpose(x_nchw, (0, 2, 3, 1)).astype(jnp.float32)
    feats = [x]
    for i, s in enumerate(_POOL_SIZES):
        pb = params["branches"][i]
        f = cba_1x1(adaptive_avg_pool_nhwc(x, s), pb["w"], pb["g"], pb["b"])
        Uh = jnp.asarray(bilinear_matrix(s, H))
        Uw = jnp.asarray(bilinear_matrix(s, W))
        feats.append(jnp.einsum('hs,nstc,wt->nhwc', Uh, f, Uw,
                                precision=jax.lax.Precision.HIGHEST))
    cat = jnp.concatenate(feats, axis=-1)
    w_full = jnp.concatenate([po["wx"], po["w1"], po["w2"], po["w3"], po["w4"]], axis=0)
    y = jnp.einsum('nhwc,co->nhwo', cat, w_full, precision=jax.lax.Precision.HIGHEST)
    y = gelu_exact(ln2d_channels_last(y, po["g"], po["b"]))
    return jnp.transpose(y, (0, 3, 1, 2))


def make_params(key, in_channels, out_channels):
    inter = in_channels // 4
    keys = jax.random.split(key, 19)
    params = {"branches": []}
    for i in range(4):
        params["branches"].append({
            "w": 0.1 * jax.random.normal(keys[3 * i], (in_channels, inter), jnp.float32),
            "g": 1.0 + 0.1 * jax.random.normal(keys[3 * i + 1], (inter,), jnp.float32),
            "b": 0.1 * jax.random.normal(keys[3 * i + 2], (inter,), jnp.float32),
        })
    # "out" conv sees concat of [x (C), f1..f4 (C/4 each)] = 2*C input channels.
    params["out"] = {
        "wx": 0.1 * jax.random.normal(keys[12], (in_channels, out_channels), jnp.float32),
        "w1": 0.1 * jax.random.normal(keys[13], (inter, out_channels), jnp.float32),
        "w2": 0.1 * jax.random.normal(keys[14], (inter, out_channels), jnp.float32),
        "w3": 0.1 * jax.random.normal(keys[15], (inter, out_channels), jnp.float32),
        "w4": 0.1 * jax.random.normal(keys[16], (inter, out_channels), jnp.float32),
        "g": 1.0 + 0.1 * jax.random.normal(keys[17], (out_channels,), jnp.float32),
        "b": 0.1 * jax.random.normal(keys[18], (out_channels,), jnp.float32),
    }
    return params


if __name__ == "__main__":
    key = jax.random.PRNGKey(0)
    k_x, k_p1, k_p2 = jax.random.split(key, 3)

    N, C, H, W = 2, 16, 16, 16              # in_channels=16 -> inter_channels=4
    x = jax.random.normal(k_x, (N, C, H, W), jnp.float32)

    # Case 1: out_channels=16 (<128) -> lane-packed kernel path, bf16 streaming.
    params1 = make_params(k_p1, C, 16)
    ppm_bf16 = jax.jit(functools.partial(pyramid_pooling_module,
                                         compute_dtype=jnp.bfloat16))
    out1 = jax.block_until_ready(ppm_bf16(x, params1))
    assert out1.shape == (N, 16, H, W), out1.shape
    ref1 = reference_ppm(x, params1)
    np.testing.assert_allclose(np.asarray(out1), np.asarray(ref1),
                               atol=2e-2, rtol=2e-2)   # bf16 streaming tolerance

    # Case 2: out_channels=128 (already lane-dense) -> plain kernel path, f32.
    params2 = make_params(k_p2, C, 128)
    ppm_f32 = jax.jit(functools.partial(pyramid_pooling_module,
                                        compute_dtype=jnp.float32))
    out2 = jax.block_until_ready(ppm_f32(x, params2))
    assert out2.shape == (N, 128, H, W), out2.shape
    ref2 = reference_ppm(x, params2)
    np.testing.assert_allclose(np.asarray(out2), np.asarray(ref2),
                               atol=2e-2, rtol=2e-2)

    print("KERNEL_OK")
</pallas_src>

<mosaic_0001>
module attributes {stable_mosaic.version = 11 : i64} {
  func.func @_fused_kernel_packed(%arg0: i32, %arg1: i32, %arg2: memref<1x32x128xbf16, #tpu.memory_space<vmem>>, %arg3: memref<32x400xbf16, #tpu.memory_space<vmem>>, %arg4: memref<128x128xbf16, #tpu.memory_space<vmem>>, %arg5: memref<1x400x128xbf16, #tpu.memory_space<vmem>>, %arg6: memref<128x128xf32, #tpu.memory_space<vmem>>, %arg7: memref<1x128xf32, #tpu.memory_space<vmem>>, %arg8: memref<1x128xf32, #tpu.memory_space<vmem>>, %arg9: memref<1x32x128xf32, #tpu.memory_space<vmem>>) attributes {dimension_semantics = [#tpu.dimension_semantics<parallel>, #tpu.dimension_semantics<parallel>], iteration_bounds = array<i64: 2, 1>, scalar_prefetch = 0 : i64, scratch_operands = 0 : i64, tpu.core_type = #tpu.core_type<tc>, window_params = [{transform_indices = @transform_0, window_bounds = array<i64: 1, 32, 128>}, {transform_indices = @transform_1, window_bounds = array<i64: 32, 400>}, {pipeline_mode = #tpu.pipeline_mode<synchronous>, transform_indices = @transform_2, window_bounds = array<i64: 128, 128>}, {transform_indices = @transform_3, window_bounds = array<i64: 1, 400, 128>}, {pipeline_mode = #tpu.pipeline_mode<synchronous>, transform_indices = @transform_4, window_bounds = array<i64: 128, 128>}, {pipeline_mode = #tpu.pipeline_mode<synchronous>, transform_indices = @transform_5, window_bounds = array<i64: 1, 128>}, {pipeline_mode = #tpu.pipeline_mode<synchronous>, transform_indices = @transform_6, window_bounds = array<i64: 1, 128>}, {transform_indices = @transform_7, window_bounds = array<i64: 1, 32, 128>}]} {
    %c0 = arith.constant 0 : index
    %c0_0 = arith.constant 0 : index
    %c0_1 = arith.constant 0 : index
    %0 = vector.load %arg2[%c0, %c0_0, %c0_1] : memref<1x32x128xbf16, #tpu.memory_space<vmem>>, vector<1x32x128xbf16>
    %1 = vector.shape_cast %0 : vector<1x32x128xbf16> to vector<32x128xbf16>
    %c0_2 = arith.constant 0 : index
    %c0_3 = arith.constant 0 : index
    %2 = vector.load %arg4[%c0_2, %c0_3] : memref<128x128xbf16, #tpu.memory_space<vmem>>, vector<128x128xbf16>
    %cst = arith.constant dense<0.000000e+00> : vector<32x128xf32>
    %3 = tpu.matmul %1, %2, %cst {dimension_numbers = #tpu.dot_dimension_numbers<[1], [0], [0], [1], [0, 0, 1, 1], [], []>} : vector<32x128xbf16>, vector<128x128xbf16>, vector<32x128xf32> -> vector<32x128xf32>
    %c0_4 = arith.constant 0 : index
    %c0_5 = arith.constant 0 : index
    %4 = vector.load %arg3[%c0_4, %c0_5] : memref<32x400xbf16, #tpu.memory_space<vmem>>, vector<32x400xbf16>
    %c0_6 = arith.constant 0 : index
    %c0_7 = arith.constant 0 : index
    %c0_8 = arith.constant 0 : index
    %5 = vector.load %arg5[%c0_6, %c0_7, %c0_8] : memref<1x400x128xbf16, #tpu.memory_space<vmem>>, vector<1x400x128xbf16>
    %6 = vector.shape_cast %5 : vector<1x400x128xbf16> to vector<400x128xbf16>
    %cst_9 = arith.constant dense<0.000000e+00> : vector<32x128xf32>
    %7 = tpu.matmul %4, %6, %cst_9 {dimension_numbers = #tpu.dot_dimension_numbers<[1], [0], [0], [1], [0, 0, 1, 1], [], []>} : vector<32x400xbf16>, vector<400x128xbf16>, vector<32x128xf32> -> vector<32x128xf32>
    %8 = arith.addf %3, %7 : vector<32x128xf32>
    %c0_10 = arith.constant 0 : index
    %c0_11 = arith.constant 0 : index
    %9 = vector.load %arg6[%c0_10, %c0_11] : memref<128x128xf32, #tpu.memory_space<vmem>>, vector<128x128xf32>
    %cst_12 = arith.constant dense<0.000000e+00> : vector<32x128xf32>
    %10 = tpu.matmul %8, %9, %cst_12 {dimension_numbers = #tpu.dot_dimension_numbers<[1], [0], [0], [1], [0, 0, 1, 1], [], []>} : vector<32x128xf32>, vector<128x128xf32>, vector<32x128xf32> -> vector<32x128xf32>
    %11 = arith.subf %8, %10 : vector<32x128xf32>
    %12 = arith.mulf %11, %11 : vector<32x128xf32>
    %c0_13 = arith.constant 0 : index
    %c0_14 = arith.constant 0 : index
    %13 = vector.load %arg6[%c0_13, %c0_14] : memref<128x128xf32, #tpu.memory_space<vmem>>, vector<128x128xf32>
    %cst_15 = arith.constant dense<0.000000e+00> : vector<32x128xf32>
    %14 = tpu.matmul %12, %13, %cst_15 {dimension_numbers = #tpu.dot_dimension_numbers<[1], [0], [0], [1], [0, 0, 1, 1], [], []>} : vector<32x128xf32>, vector<128x128xf32>, vector<32x128xf32> -> vector<32x128xf32>
    %cst_16 = arith.constant 9.99999974E-6 : f32
    %15 = vector.broadcast %cst_16 : f32 to vector<32x128xf32>
    %16 = arith.addf %14, %15 : vector<32x128xf32>
    %17 = math.rsqrt %16 : vector<32x128xf32>
    %18 = arith.mulf %11, %17 : vector<32x128xf32>
    %c0_17 = arith.constant 0 : index
    %c0_18 = arith.constant 0 : index
    %19 = vector.load %arg7[%c0_17, %c0_18] : memref<1x128xf32, #tpu.memory_space<vmem>>, vector<1x128xf32>
    %20 = vector.broadcast %19 : vector<1x128xf32> to vector<32x128xf32>
    %21 = arith.mulf %18, %20 : vector<32x128xf32>
    %c0_19 = arith.constant 0 : index
    %c0_20 = arith.constant 0 : index
    %22 = vector.load %arg8[%c0_19, %c0_20] : memref<1x128xf32, #tpu.memory_space<vmem>>, vector<1x128xf32>
    %23 = vector.broadcast %22 : vector<1x128xf32> to vector<32x128xf32>
    %24 = arith.addf %21, %23 : vector<32x128xf32>
    %cst_21 = arith.constant 5.000000e-01 : f32
    %25 = vector.broadcast %cst_21 : f32 to vector<32x128xf32>
    %26 = arith.mulf %25, %24 : vector<32x128xf32>
    %cst_22 = arith.constant 0.707106769 : f32
    %27 = vector.broadcast %cst_22 : f32 to vector<32x128xf32>
    %28 = arith.mulf %24, %27 : vector<32x128xf32>
    %29 = math.erf %28 : vector<32x128xf32>
    %cst_23 = arith.constant 1.000000e+00 : f32
    %30 = vector.broadcast %cst_23 : f32 to vector<32x128xf32>
    %31 = arith.addf %30, %29 : vector<32x128xf32>
    %32 = arith.mulf %26, %31 : vector<32x128xf32>
    %c0_24 = arith.constant 0 : index
    %c0_25 = arith.constant 0 : index
    %c0_26 = arith.constant 0 : index
    %33 = vector.load %arg9[%c0_24, %c0_25, %c0_26] : memref<1x32x128xf32, #tpu.memory_space<vmem>>, vector<1x32x128xf32>
    %34 = vector.shape_cast %33 : vector<1x32x128xf32> to vector<32x128xf32>
    %35 = vector.shape_cast %32 : vector<32x128xf32> to vector<1x32x128xf32>
    tpu.vector_store %arg9[%c0_24, %c0_25, %c0_26], %35 {strides = array<i32>} : memref<1x32x128xf32, #tpu.memory_space<vmem>>, vector<1x32x128xf32>,
    return
  }
  func.func @transform_0(%arg0: i32, %arg1: i32) -> (i32, i32, i32) {
    %c0_i32 = arith.constant 0 : i32
    %c0_i32_0 = arith.constant 0 : i32
    return %arg0, %arg1, %c0_i32 : i32, i32, i32
  }
  func.func @transform_1(%arg0: i32, %arg1: i32) -> (i32, i32) {
    %c0_i32 = arith.constant 0 : i32
    %c0_i32_0 = arith.constant 0 : i32
    return %arg1, %c0_i32 : i32, i32
  }
  func.func @transform_2(%arg0: i32, %arg1: i32) -> (i32, i32) {
    %c0_i32 = arith.constant 0 : i32
    %c0_i32_0 = arith.constant 0 : i32
    %c0_i32_1 = arith.constant 0 : i32
    return %c0_i32, %c0_i32_0 : i32, i32
  }
  func.func @transform_3(%arg0: i32, %arg1: i32) -> (i32, i32, i32) {
    %c0_i32 = arith.constant 0 : i32
    %c0_i32_0 = arith.constant 0 : i32
    %c0_i32_1 = arith.constant 0 : i32
    return %arg0, %c0_i32, %c0_i32_0 : i32, i32, i32
  }
  func.func @transform_4(%arg0: i32, %arg1: i32) -> (i32, i32) {
    %c0_i32 = arith.constant 0 : i32
    %c0_i32_0 = arith.constant 0 : i32
    %c0_i32_1 = arith.constant 0 : i32
    return %c0_i32, %c0_i32_0 : i32, i32
  }
  func.func @transform_5(%arg0: i32, %arg1: i32) -> (i32, i32) {
    %c0_i32 = arith.constant 0 : i32
    %c0_i32_0 = arith.constant 0 : i32
    %c0_i32_1 = arith.constant 0 : i32
    return %c0_i32, %c0_i32_0 : i32, i32
  }
  func.func @transform_6(%arg0: i32, %arg1: i32) -> (i32, i32) {
    %c0_i32 = arith.constant 0 : i32
    %c0_i32_0 = arith.constant 0 : i32
    %c0_i32_1 = arith.constant 0 : i32
    return %c0_i32, %c0_i32_0 : i32, i32
  }
  func.func @transform_7(%arg0: i32, %arg1: i32) -> (i32, i32, i32) {
    %c0_i32 = arith.constant 0 : i32
    %c0_i32_0 = arith.constant 0 : i32
    return %arg0, %arg1, %c0_i32 : i32, i32, i32
  }
}

</mosaic_0001>

<bundles_post_ra>
// kernel: tile.13
= control target key start
LH: loop header
LB: loop body
LE: loop exit
PB: predicated region body
PF: predicated region fallthrough
CT: control target
= control target key end

     0   :  { %s22_s0 = inlined_call_operand.vmem [shape: f32[16], index: 0, kind: input, shape index: {}]   ;;  %s23_s1 = inlined_call_operand.vmem [shape: f32[8,16], index: 1, kind: output, shape index: {}]  }
   0x1   :  { %v4_v0 = vld [vmem:[%s22_s0] ss:$0 sm:$0xff] }
   0x2   :  { %5 = vst [vmem:[%s23_s1] sm:$0xff] %v4_v0 }

// kernel: tile.14
= control target key start
LH: loop header
LB: loop body
LE: loop exit
PB: predicated region body
PF: predicated region fallthrough
CT: control target
= control target key end

     0   :  { %s67_s10 = smov 112   ;;  %s68_s11 = smov 80   ;;  %vm3_vm0 = vcmask 130048   ;;  %vm9_vm1 = vcmask 1048448   ;;  %vm15_vm2 = vcmask 917248   ;;  %vm21_vm3 = vcmask 786048   ;;  %s111_s0 = inlined_call_operand.vmem [shape: f32[8,16], index: 0, kind: input, shape index: {}]   ;;  %s112_s1 = inlined_call_operand.vmem [shape: f32[1,128], index: 1, kind: output, shape index: {}]  }
   0x1   :  { %v53_v0 = vld [vmem:[%s111_s0 + $0x7] sm:$0x1]   ;;  %v55_v1 = vld [vmem:[%s111_s0 + $0x5] sm:$0x1]   ;;  %v57_v2 = vld [vmem:[%s111_s0 + $0x3] sm:$0x1]  }
   0x2   :  { %7 = vrot.lane.b32.xlu0 %v53_v0, %s67_s10  ;;  %19 = vrot.lane.b32.xlu1 %v55_v1, %s68_s11  ;;  %s69_s14 = smov 48   ;;  %v54_v3 = vld [vmem:[%s111_s0 + $0x6] sm:$0x1]   ;;  %v56_v4 = vld [vmem:[%s111_s0 + $0x4] sm:$0x1]   ;;  %s70_s21 = smov 96  }
   0x3   :  { %31 = vrot.lane.b32.xlu2 %v57_v2, %s69_s14  ;;  %v58_v5 = vld [vmem:[%s111_s0 + $0x2] sm:$0x1]   ;;  %s71_s22 = smov 64   ;;  %s72_s23 = smov 32   ;;  %v59_v6 = vld [vmem:[%s111_s0 + $0x1] sm:$0x1]  }
   0x4   :  { %s73_s26 = smov 16   ;;  %v2_v7 = vld [vmem:[%s111_s0] sm:$0x1]   ;;  %vm27_vm4 = vcmask 654848   ;;  %vm33_vm5 = vcmask 523648   ;;  %vm39_vm6 = vcmask 392448  }
   0x5   :  { %4 = vst.msk [vmem:[#allocation0] sm:$0x1] %vm3_vm0, %v2_v7   ;;  %vm45_vm7 = vcmask 261248  }
   0xa   :  { %13 = vrot.lane.b32.xlu0 %v54_v3, %s70_s21  ;;  %25 = vrot.lane.b32.xlu1 %v56_v4, %s71_s22 }
   0xb   :  { %37 = vrot.lane.b32.xlu2 %v58_v5, %s72_s23 }
  0x12   :  { %43 = vrot.lane.b32.xlu0 %v59_v6, %s73_s26 }
  0x5d   :  { %v32_v8 = vpop.permute.xlu2 %31  }
  0x65   :  { %v38_v9 = vpop.permute.xlu2 %37  }
  0x74   :  { %v8_v10 = vpop.permute.xlu0 %7   ;;  %v20_v11 = vpop.permute.xlu1 %19  }
  0x75   :  { %10 = vst.msk [vmem:[#allocation0] sm:$0x1] %vm9_vm1, %v8_v10  }
  0x7c   :  { %v14_v12 = vpop.permute.xlu0 %13   ;;  %v26_v13 = vpop.permute.xlu1 %25  }
  0x7d   :  { %16 = vst.msk [vmem:[#allocation0] sm:$0x1] %vm15_vm2, %v14_v12  }
  0x7e   :  { %22 = vst.msk [vmem:[#allocation0] sm:$0x1] %vm21_vm3, %v20_v11  }
  0x7f   :  { %28 = vst.msk [vmem:[#allocation0] sm:$0x1] %vm27_vm4, %v26_v13  }
  0x80   :  { %34 = vst.msk [vmem:[#allocation0] sm:$0x1] %vm33_vm5, %v32_v8  }
  0x81   :  { %40 = vst.msk [vmem:[#allocation0] sm:$0x1] %vm39_vm6, %v38_v9  }
  0x84   :  { %v44_v14 = vpop.permute.xlu0 %43  }
  0x85   :  { %46 = vst.msk [vmem:[#allocation0] sm:$0x1] %vm45_vm7, %v44_v14  }
  0x8c   :  { %v49_v15 = vld [vmem:[#allocation0] sm:$0x1] }
  0x8d   :  { %52 = vst [vmem:[%s112_s1] sm:$0x1] %v49_v15 }

// kernel: pyramid_pooling_module.1
= control target key start
LH: loop header
LB: loop body
LE: loop exit
PB: predicated region body
PF: predicated region fallthrough
CT: control target
= control target key end

     0   :  { %s1603_s24 = smov 0   ;;  %s1605_s25 = smov 0   ;;  %s1911_s0 = inlined_call_operand.vmem [shape: bf16[2,32,128], index: 0, kind: input, shape index: {}]   ;;  %s1912_s1 = inlined_call_operand.vmem [shape: bf16[32,400], index: 1, kind: input, shape index: {}]   ;;  %s1913_s2 = inlined_call_operand.vmem [shape: bf16[128,128], index: 2, kind: input, shape index: {}]   ;;  %s1914_s3 = inlined_call_operand.vmem [shape: bf16[2,400,128], index: 3, kind: input, shape index: {}]   ;;  %s1915_s4 = inlined_call_operand.vmem [shape: f32[128,128], index: 4, kind: input, shape index: {}]   ;;  %s1916_s5 = inlined_call_operand.vmem [shape: f32[1,128], index: 5, kind: input, shape index: {}]   ;;  %s1917_s6 = inlined_call_operand.vmem [shape: f32[1,128], index: 6, kind: input, shape index: {}]   ;;  %s1918_s7 = inlined_call_operand.vmem [shape: f32[2,32,128], index: 7, kind: output, shape index: {}]  }
   0x1   :  { %s1607_s26 = smov 0  }
   0x2 LB: > { %s29_s27 = sadd.s32 1, %s1557_s25  ;;  %p1233_p0 = scmp.ge.s32.totalorder %s1561_s26, 1  ;;  %s1561_s26 = sphi %s1607_s26, %s17_s26   ;;  %s1557_s25 = sphi %s1605_s25, %s1920_s25   ;;  %s1553_s24 = sphi %s1603_s24, %s1919_s24  }
   0x3   : > { %p31_p1 = scmp.ge.s32.totalorder %s29_s27, 2  ;;  %p280_p2 = scmp.lt.s32.totalorder %s1561_s26, 3 }
   0x5   : > { %s1922_s27 = smov (%p31_p1, %s29_s27), 0  ;;  %p281_p3 = pnand %p1233_p0, %p280_p2 }
   0x6   : > { %p332_p4 = scmp.lt.s32.totalorder (!%p281_p3), %s1553_s24, 1 }
   0x7   : > { %284 = sbr.rel (%p281_p3) target bundleno = 558 (0x22e), region = 48 }
   0xc   : > { %s1924_s24 = smov (!%p332_p4, %s1553_s24), 1  ;;  %v1432_v0 = vld [vmem:[%s1912_s1 + $0xc] sm:$0xf]  ;;  %v1251_v1 = vld [vmem:[%s1912_s1 + $0x18] sm:$0xf0]  ;;  %vm630_vm0 = vcmask 130048  }
   0xd   : > { %s1496_s28 = smul.u32 200, %s1924_s24  ;;  %v1430_v2 = vld [vmem:[%s1913_s2 + $0x38] sm:$0xff]  ;;  %v1254_v7 = vor.u32 %v1432_v0, %v1251_v1  ;;  %v1429_v11 = vld [vmem:[%s1913_s2 + $0x30] sm:$0xff]  ;;  %v1428_v15 = vld [vmem:[%s1913_s2 + $0x28] sm:$0xff]  ;;  %s1420_s22 = sshll.u32 %s1924_s24, 5 }
   0xe   : > { %v1427_v19 = vld [vmem:[%s1913_s2 + $0x20] sm:$0xff]  ;;  %v1436_v21 = vld [vmem:[%s1912_s1 + $0x2c] sm:$0xf]  ;;  %v1267_v24 = vld [vmem:[%s1912_s1 + $0x38] sm:$0xf0]  ;;  %s1880_s29 = scalar_lea.vmem %s1918_s7, %s1420_s22 }
   0xf   : > { %s1627_s8 = scalar_lea.vmem %s1914_s3, %s1496_s28  ;;  %v1426_v25 = vld [vmem:[%s1913_s2 + $0x18] sm:$0xff]  ;;  %v1270_v26 = vor.u32 %v1436_v21, %v1267_v24  ;;  %v1425_v30 = vld [vmem:[%s1913_s2 + $0x10] sm:$0xff]  ;;  %v1424_v34 = vld [vmem:[%s1913_s2 + $0x8] sm:$0xff] }
  0x10   : > { %v1446_v3 = vld [vmem:[%s1627_s8 + $0x38] sm:$0xff]  ;;  %v1463_v6 = vld [vmem:[%s1627_s8 + $0xc0] sm:$0xff]  ;;  %v1445_v8 = vld [vmem:[%s1627_s8 + $0x30] sm:$0xff] }
  0x11   : > { %v1454_v4 = vld [vmem:[%s1627_s8 + $0x78] sm:$0xff]  ;;  %637 = vmatpush.bf16.msra.mxu0 %v1446_v3  ;;  %701 = vmatpush.bf16.msra.mxu3 %v1463_v6  ;;  %v1453_v9 = vld [vmem:[%s1627_s8 + $0x70] sm:$0xff]  ;;  %v1444_v12 = vld [vmem:[%s1627_s8 + $0x28] sm:$0xff] }
  0x12   : > { %v1462_v5 = vld [vmem:[%s1627_s8 + $0xb8] sm:$0xff]  ;;  %656 = vmatpush.bf16.msra.mxu1 %v1454_v4  ;;  %v1461_v10 = vld [vmem:[%s1627_s8 + $0xb0] sm:$0xff]  ;;  %v1452_v13 = vld [vmem:[%s1627_s8 + $0x68] sm:$0xff] }
  0x13   : > { %675 = vmatpush.bf16.msra.mxu2 %v1462_v5  ;;  %v1460_v14 = vld [vmem:[%s1627_s8 + $0xa8] sm:$0xff]  ;;  %v1443_v16 = vld [vmem:[%s1627_s8 + $0x20] sm:$0xff]  ;;  %v1442_v20 = vld [vmem:[%s1627_s8 + $0x18] sm:$0xff] }
  0x14   : > { %1371 = vmatmul.msk.bf16.vlgmr.msra.gmra.mxu3 %vm630_vm0, %v1254_v7  ;;  %v1451_v17 = vld [vmem:[%s1627_s8 + $0x60] sm:$0xff]  ;;  %v1450_v22 = vld [vmem:[%s1627_s8 + $0x58] sm:$0xff]  ;;  %v1441_v27 = vld [vmem:[%s1627_s8 + $0x10] sm:$0xff] }
  0x15   : > { %773 = vmatpush.bf16.msrb.mxu3 %v1430_v2  ;;  %638 = vmatpush.bf16.msra.mxu0 %v1445_v8  ;;  %v1459_v18 = vld [vmem:[%s1627_s8 + $0xa0] sm:$0xff]  ;;  %v1458_v23 = vld [vmem:[%s1627_s8 + $0x98] sm:$0xff]  ;;  %v1449_v28 = vld [vmem:[%s1627_s8 + $0x50] sm:$0xff] }
  0x16   : > { %657 = vmatpush.bf16.msra.mxu1 %v1453_v9  ;;  %v1457_v29 = vld [vmem:[%s1627_s8 + $0x90] sm:$0xff]  ;;  %v1440_v31 = vld [vmem:[%s1627_s8 + $0x8] sm:$0xff]  ;;  %v1241_v35 = vld [vmem:[%s1912_s1] sm:$0xf] }
  0x17   : > { %676 = vmatpush.bf16.msra.mxu2 %v1461_v10  ;;  %v1448_v32 = vld [vmem:[%s1627_s8 + $0x48] sm:$0xff]  ;;  %v1433_v36 = vld [vmem:[%s1912_s1 + $0xc] sm:$0xf0]  ;;  %v1431_v37 = vld [vmem:[%s1912_s1 + $0x4] sm:$0xf] }
  0x18   : > { %v1456_v33 = vld [vmem:[%s1627_s8 + $0x88] sm:$0xff]  ;;  %v1439_v38 = vld [vmem:[%s1627_s8] sm:$0xff]  ;;  %v1243_v41 = vld [vmem:[%s1912_s1 + $0x10] sm:$0xf0]  ;;  %v1242_v45 = vor.u32 %v1433_v36, %v1241_v35 }
  0x19   : > { %774 = vmatpush.bf16.msrb.mxu3 %v1429_v11  ;;  %639 = vmatpush.bf16.msra.mxu0 %v1444_v12  ;;  %v1447_v39 = vld [vmem:[%s1627_s8 + $0x40] sm:$0xff]  ;;  %v1249_v42 = vld [vmem:[%s1912_s1 + $0x8] sm:$0xf]  ;;  %v1434_v43 = vld [vmem:[%s1912_s1 + $0x14] sm:$0xf0]  ;;  %v1246_v46 = vor.u32 %v1431_v37, %v1243_v41 }
  0x1a   : > { %658 = vmatpush.bf16.msra.mxu1 %v1452_v13  ;;  %v1455_v40 = vld [vmem:[%s1627_s8 + $0x80] sm:$0xff]  ;;  %s1419_s8 = sshll.u32 %s1924_s24, 4  ;;  %v1250_v47 = vor.u32 %v1434_v43, %v1249_v42  ;;  %v1437_v50 = vld [vmem:[%s1912_s1 + $0x2c] sm:$0xf0]  ;;  %v1259_v52 = vld [vmem:[%s1912_s1 + $0x30] sm:$0xf0] }
  0x1b   : > { %677 = vmatpush.bf16.msra.mxu2 %v1460_v14  ;;  %v1423_v44 = vld [vmem:[%s1913_s2] sm:$0xff]  ;;  %s339_s11 = scalar_lea.vmem %s1911_s0, %s1419_s8  ;;  %v1265_v53 = vld [vmem:[%s1912_s1 + $0x28] sm:$0xf]  ;;  %v1438_v54 = vld [vmem:[%s1912_s1 + $0x34] sm:$0xf0] }
  0x1c   : > { %v1421_v48 = vld [vmem:[%s339_s11] sm:$0xff]  ;;  %v1266_v57 = vor.u32 %v1438_v54, %v1265_v53  ;;  %v1422_v58 = vld [vmem:[%s339_s11 + $0x8] sm:$0xff]  ;;  %v807_v59 = vld [vmem:[%s1915_s4 + $0x78] sm:$0xff] }
  0x1d   : > { %775 = vmatpush.bf16.msrb.mxu3 %v1428_v15  ;;  %640 = vmatpush.bf16.msra.mxu0 %v1443_v16  ;;  %v1257_v49 = vld [vmem:[%s1912_s1 + $0x20] sm:$0xf]  ;;  %v1435_v51 = vld [vmem:[%s1912_s1 + $0x24] sm:$0xf]  ;;  %v806_v60 = vld [vmem:[%s1915_s4 + $0x70] sm:$0xff] }
  0x1e   : > { %659 = vmatpush.bf16.msra.mxu1 %v1451_v17  ;;  %v1258_v55 = vor.u32 %v1437_v50, %v1257_v49  ;;  %v1262_v56 = vor.u32 %v1435_v51, %v1259_v52  ;;  %v805_v61 = vld [vmem:[%s1915_s4 + $0x68] sm:$0xff]  ;;  %v804_v62 = vld [vmem:[%s1915_s4 + $0x60] sm:$0xff]  ;;  %v803_v63 = vld [vmem:[%s1915_s4 + $0x58] sm:$0xff] }
  0x1f   : > { %678 = vmatpush.bf16.msra.mxu2 %v1459_v18  ;;  %v802_v0 = vld [vmem:[%s1915_s4 + $0x50] sm:$0xff]  ;;  %v801_v1 = vld [vmem:[%s1915_s4 + $0x48] sm:$0xff]  ;;  %v800_v2 = vld [vmem:[%s1915_s4 + $0x40] sm:$0xff] }
  0x20   : > { %v799_v3 = vld [vmem:[%s1915_s4 + $0x38] sm:$0xff]  ;;  %v798_v4 = vld [vmem:[%s1915_s4 + $0x30] sm:$0xff]  ;;  %v797_v5 = vld [vmem:[%s1915_s4 + $0x28] sm:$0xff] }
  0x21   : > { %776 = vmatpush.bf16.msrb.mxu3 %v1427_v19  ;;  %641 = vmatpush.bf16.msra.mxu0 %v1442_v20  ;;  %v796_v6 = vld [vmem:[%s1915_s4 + $0x20] sm:$0xff]  ;;  %v795_v7 = vld [vmem:[%s1915_s4 + $0x18] sm:$0xff]  ;;  %v794_v8 = vld [vmem:[%s1915_s4 + $0x10] sm:$0xff] }
  0x22   : > { %660 = vmatpush.bf16.msra.mxu1 %v1450_v22  ;;  %v793_v9 = vld [vmem:[%s1915_s4 + $0x8] sm:$0xff]  ;;  %v792_v11 = vld [vmem:[%s1915_s4] sm:$0xff] }
  0x23   : > { %679 = vmatpush.bf16.msra.mxu2 %v1458_v23 }
  0x24   : > { %1372 = vmatmul.msk.bf16.gmra.mxu3 %vm630_vm0, %v1270_v26 }
  0x25   : > { %777 = vmatpush.bf16.msrb.mxu3 %v1426_v25  ;;  %642 = vmatpush.bf16.msra.mxu0 %v1441_v27 }
  0x26   : > { %661 = vmatpush.bf16.msra.mxu1 %v1449_v28 }
  0x27   : > { %680 = vmatpush.bf16.msra.mxu2 %v1457_v29 }
  0x29   : > { %778 = vmatpush.bf16.msrb.mxu3 %v1425_v30  ;;  %643 = vmatpush.bf16.msra.mxu0 %v1440_v31 }
  0x2a   : > { %662 = vmatpush.bf16.msra.mxu1 %v1448_v32 }
  0x2b   : > { %681 = vmatpush.bf16.msra.mxu2 %v1456_v33 }
  0x2d   : > { %779 = vmatpush.bf16.msrb.mxu3 %v1424_v34  ;;  %644 = vmatpush.bf16.msra.mxu0 %v1439_v38 }
  0x2e   : > { %663 = vmatpush.bf16.msra.mxu1 %v1447_v39 }
  0x2f   : > { %682 = vmatpush.bf16.msra.mxu2 %v1455_v40 }
  0x30   : > { %645 = vmatmul.bf16.vlgmr.msra.gmra.mxu0 %v1242_v45 }
  0x31   : > { %780 = vmatpush.bf16.msrb.mxu3 %v1423_v44  ;;  %664 = vmatmul.bf16.vlgmr.msra.gmra.mxu1 %v1246_v46 }
  0x32   : > { %683 = vmatmul.bf16.vlgmr.msra.gmra.mxu2 %v1250_v47  ;;  %808 = vmatpush.msrb.mxu0 %v807_v59 }
  0x33   : > { %1464 = vmatpush.msrb.mxu2 %v807_v59  ;;  %845 = vmatpush.msrb.mxu1 %v807_v59 }
  0x34   : > { %781 = vmatmul.bf16.vlgmr.msrb.gmra.mxu3 %v1421_v48  ;;  %809 = vmatpush.msrb.mxu0 %v806_v60 }
  0x35   : > { %1480 = vmatpush.msra.mxu3 %v807_v59  ;;  %1465 = vmatpush.msrb.mxu2 %v806_v60 }
  0x36   : > { %846 = vmatpush.msrb.mxu1 %v806_v60  ;;  %810 = vmatpush.msrb.mxu0 %v805_v61 }
  0x37   : > { %1481 = vmatpush.msra.mxu3 %v806_v60  ;;  %1466 = vmatpush.msrb.mxu2 %v805_v61 }
  0x38   : > { %847 = vmatpush.msrb.mxu1 %v805_v61  ;;  %811 = vmatpush.msrb.mxu0 %v804_v62 }
  0x39   : > { %1482 = vmatpush.msra.mxu3 %v805_v61  ;;  %1467 = vmatpush.msrb.mxu2 %v804_v62 }
  0x3a   : > { %848 = vmatpush.msrb.mxu1 %v804_v62  ;;  %812 = vmatpush.msrb.mxu0 %v803_v63 }
  0x3b   : > { %1483 = vmatpush.msra.mxu3 %v804_v62  ;;  %1468 = vmatpush.msrb.mxu2 %v803_v63 }
  0x3c   : > { %849 = vmatpush.msrb.mxu1 %v803_v63  ;;  %813 = vmatpush.msrb.mxu0 %v802_v0 }
  0x3d   : > { %1484 = vmatpush.msra.mxu3 %v803_v63  ;;  %1469 = vmatpush.msrb.mxu2 %v802_v0 }
  0x3e   : > { %850 = vmatpush.msrb.mxu1 %v802_v0  ;;  %814 = vmatpush.msrb.mxu0 %v801_v1 }
  0x3f   : > { %1485 = vmatpush.msra.mxu3 %v802_v0  ;;  %1470 = vmatpush.msrb.mxu2 %v801_v1 }
  0x40   : > { %650 = vmatmul.bf16.gmra.mxu0 %v1258_v55  ;;  %851 = vmatpush.msrb.mxu1 %v801_v1 }
  0x41   : > { %669 = vmatmul.bf16.gmra.mxu1 %v1262_v56  ;;  %1486 = vmatpush.msra.mxu3 %v801_v1 }
  0x42   : > { %688 = vmatmul.bf16.gmra.mxu2 %v1266_v57  ;;  %815 = vmatpush.msrb.mxu0 %v800_v2 }
  0x43   : > { %1471 = vmatpush.msrb.mxu2 %v800_v2  ;;  %852 = vmatpush.msrb.mxu1 %v800_v2 }
  0x44   : > { %786 = vmatmul.bf16.gmra.mxu3 %v1422_v58  ;;  %816 = vmatpush.msrb.mxu0 %v799_v3 }
  0x45   : > { %1487 = vmatpush.msra.mxu3 %v800_v2  ;;  %1472 = vmatpush.msrb.mxu2 %v799_v3 }
  0x46   : > { %853 = vmatpush.msrb.mxu1 %v799_v3  ;;  %817 = vmatpush.msrb.mxu0 %v798_v4 }
  0x47   : > { %1488 = vmatpush.msra.mxu3 %v799_v3  ;;  %1473 = vmatpush.msrb.mxu2 %v798_v4 }
  0x48   : > { %854 = vmatpush.msrb.mxu1 %v798_v4  ;;  %818 = vmatpush.msrb.mxu0 %v797_v5 }
  0x49   : > { %1489 = vmatpush.msra.mxu3 %v798_v4  ;;  %1474 = vmatpush.msrb.mxu2 %v797_v5 }
  0x4a   : > { %855 = vmatpush.msrb.mxu1 %v797_v5  ;;  %819 = vmatpush.msrb.mxu0 %v796_v6 }
  0x4b   : > { %1490 = vmatpush.msra.mxu3 %v797_v5  ;;  %1475 = vmatpush.msrb.mxu2 %v796_v6  ;;  %v1791_v5 = vld [vmem:[%s1916_s5] ss:$0 sm:$0xff] }
  0x4c   : > { %856 = vmatpush.msrb.mxu1 %v796_v6  ;;  %820 = vmatpush.msrb.mxu0 %v795_v7 }
  0x4d   : > { %1491 = vmatpush.msra.mxu3 %v796_v6  ;;  %1476 = vmatpush.msrb.mxu2 %v795_v7 }
  0x4e   : > { %857 = vmatpush.msrb.mxu1 %v795_v7  ;;  %821 = vmatpush.msrb.mxu0 %v794_v8 }
  0x4f   : > { %1492 = vmatpush.msra.mxu3 %v795_v7  ;;  %1477 = vmatpush.msrb.mxu2 %v794_v8 }
  0x50   : > { %858 = vmatpush.msrb.mxu1 %v794_v8  ;;  %822 = vmatpush.msrb.mxu0 %v793_v9 }
  0x51   : > { %1493 = vmatpush.msra.mxu3 %v794_v8  ;;  %1478 = vmatpush.msrb.mxu2 %v793_v9  ;;  %v1796_v8 = vld [vmem:[%s1917_s6] ss:$0 sm:$0xff] }
  0x52   : > { %859 = vmatpush.msrb.mxu1 %v793_v9  ;;  %823 = vmatpush.msrb.mxu0 %v792_v11 }
  0x53   : > { %1494 = vmatpush.msra.mxu3 %v793_v9  ;;  %1479 = vmatpush.msrb.mxu2 %v792_v11 }
  0x54   : > { %860 = vmatpush.msrb.mxu1 %v792_v11 }
  0x55   : > { %1495 = vmatpush.msra.mxu3 %v792_v11 }
  0x97   : > { %v703_v10 = vpop.f32.mrf.mxu3 }
  0x9f   : > { %v705_v12 = vpop.f32.mrf.mxu3 }
  0xa7   : > { %v708_v13 = vpop.f32.mrf.mxu3 }
  0xad   : > { %v646_v14 = vpop.f32.mrf.mxu0 }
  0xae   : > { %v665_v15 = vpop.f32.mrf.mxu1 }
  0xaf   : > { %v710_v16 = vpop.f32.mrf.mxu3  ;;  %v666_v17 = vadd.f32 %v665_v15, %v646_v14 }
  0xb5   : > { %v684_v18 = vpop.f32.mrf.mxu2  ;;  %v648_v20 = vpop.f32.mrf.mxu0 }
  0xb6   : > { %v685_v19 = vadd.f32 %v684_v18, %v666_v17  ;;  %v667_v21 = vpop.f32.mrf.mxu1 }
  0xb7   : > { %v782_v23 = vpop.f32.mrf.mxu3  ;;  %v668_v25 = vadd.f32 %v667_v21, %v648_v20 }
  0xb8   : > { %v704_v22 = vadd.f32 %v703_v10, %v685_v19 }
  0xba   : > { %v783_v24 = vadd.f32 %v782_v23, %v704_v22 }
  0xbc   : > { %824 = vmatmul.f32.vlgmr.msrb.gmra.mxu0 %v783_v24 }
  0xbd   : > { %v686_v26 = vpop.f32.mrf.mxu2  ;;  %v651_v28 = vpop.f32.mrf.mxu0 }
  0xbe   : > { %v687_v27 = vadd.f32 %v686_v26, %v668_v25  ;;  %v670_v29 = vpop.f32.mrf.mxu1 }
  0xbf   : > { %v784_v31 = vpop.f32.mrf.mxu3  ;;  %v671_v32 = vadd.f32 %v670_v29, %v651_v28 }
  0xc0   : > { %v706_v30 = vadd.f32 %v705_v12, %v687_v27 }
  0xc2   : > { %v785_v33 = vadd.f32 %v784_v31, %v706_v30 }
  0xc4   : > { %827 = vmatmul.f32.vlgmr.msrb.gmra.mxu2 %v785_v33 }
  0xc5   : > { %v689_v34 = vpop.f32.mrf.mxu2  ;;  %v653_v36 = vpop.f32.mrf.mxu0 }
  0xc6   : > { %v690_v35 = vadd.f32 %v689_v34, %v671_v32  ;;  %v672_v38 = vpop.f32.mrf.mxu1 }
  0xc7   : > { %v787_v39 = vpop.f32.mrf.mxu3  ;;  %v673_v41 = vadd.f32 %v672_v38, %v653_v36 }
  0xc8   : > { %v709_v37 = vadd.f32 %v708_v13, %v690_v35 }
  0xca   : > { %v788_v40 = vadd.f32 %v787_v39, %v709_v37 }
  0xcc   : > { %830 = vmatmul.f32.gmra.mxu2 %v788_v40 }
  0xcd   : > { %v691_v42 = vpop.f32.mrf.mxu2 }
  0xce   : > { %v692_v43 = vadd.f32 %v691_v42, %v673_v41 }
  0xcf   : > { %v789_v45 = vpop.f32.mrf.mxu3 }
  0xd0   : > { %v711_v44 = vadd.f32 %v710_v16, %v692_v43 }
  0xd2   : > { %v790_v46 = vadd.f32 %v789_v45, %v711_v44 }
  0xd4   : > { %833 = vmatmul.f32.gmra.mxu2 %v790_v46 }
 0x139   : > { %v825_v47 = vpop.f32.mrf.mxu0 }
 0x13a   : > { %v837_v48 = vsub.f32 %v783_v24, %v825_v47 }
 0x13c   : > { %v841_v49 = vmul.f32 %v837_v48, %v837_v48 }
 0x13e   : > { %861 = vmatmul.f32.vlgmr.msrb.gmra.mxu1 %v841_v49 }
 0x147   : > { %v828_v50 = vpop.f32.mrf.mxu2 }
 0x148   : > { %v838_v51 = vsub.f32 %v785_v33, %v828_v50 }
 0x14a   : > { %v842_v52 = vmul.f32 %v838_v51, %v838_v51 }
 0x14c   : > { %864 = vmatmul.f32.gmra.mxu1 %v842_v52 }
 0x14f   : > { %v831_v53 = vpop.f32.mrf.mxu2 }
 0x150   : > { %v1780_v54 = vsub.f32 %v788_v40, %v831_v53 }
 0x152   : > { %v843_v55 = vmul.f32 %v1780_v54, %v1780_v54 }
 0x154   : > { %867 = vmatmul.f32.gmra.mxu1 %v843_v55 }
 0x157   : > { %v834_v56 = vpop.f32.mrf.mxu2 }
 0x158   : > { %v1784_v57 = vsub.f32 %v790_v46, %v834_v56 }
 0x15a   : > { %v844_v58 = vmul.f32 %v1784_v57, %v1784_v57 }
 0x15c   : > { %870 = vmatmul.f32.vlgmr.msra.gmra.mxu3 %v844_v58 }
 0x1bb   : > { %v862_v59 = vpop.f32.mrf.mxu1 }
 0x1bc   : > { %v863_v60 = vadd.f32 1e-05, %v862_v59 }
 0x1be   : > { %1523 = vrsqrt.f32 %v863_v60  ;;  %vm880_vm2 = vweird.f32 %v863_v60 }
 0x1c4   : > { %v1524_v61 = vpop.eup %1523 }
 0x1c5   : > { %v875_v62 = vmul.f32 %v1524_v61, %v863_v60  ;;  %vm881_vm1 = vweird.f32 %v1524_v61 }
 0x1c6   : > { %vm882_vm3 = vmor %vm880_vm2, %vm881_vm1 }
 0x1c7   : > { %v876_v63 = vmul.f32 %v1524_v61, %v875_v62 }
 0x1c9   : > { %v877_v0 = vmul.f32 0.5, %v876_v63  ;;  %v865_v1 = vpop.f32.mrf.mxu1 }
 0x1ca   : > { %v866_v2 = vadd.f32 1e-05, %v865_v1 }
 0x1cb   : > { %v878_v3 = vsub.f32 1.5, %v877_v0 }
 0x1cc   : > { %1525 = vrsqrt.f32 %v866_v2  ;;  %vm890_vm5 = vweird.f32 %v866_v2 }
 0x1cd   : > { %v879_v4 = vmul.f32 %v1524_v61, %v878_v3 }
 0x1cf   : > { %v883_v6 = vsel %vm882_vm3, %v1524_v61, %v879_v4 }
 0x1d0   : > { %v914_v7 = vmul.f32 %v883_v6, %v837_v48 }
 0x1d1   : > { %v868_v9 = vpop.f32.mrf.mxu1 }
 0x1d2   : > { %v1526_v10 = vpop.eup %1525  ;;  %v922_v11 = vmul.f32 %v1791_v5, %v914_v7  ;;  %v869_v12 = vadd.f32 1e-05, %v868_v9 }
 0x1d3   : > { %v885_v13 = vmul.f32 %v1526_v10, %v866_v2  ;;  %vm891_vm4 = vweird.f32 %v1526_v10 }
 0x1d4   : > { %v1800_v14 = vadd.f32 %v1796_v8, %v922_v11  ;;  %1527 = vrsqrt.f32 %v869_v12  ;;  %vm892_vm6 = vmor %vm890_vm5, %vm891_vm4  ;;  %vm900_vm8 = vweird.f32 %v869_v12 }
 0x1d5   : > { %v886_v15 = vmul.f32 %v1526_v10, %v885_v13 }
 0x1d6   : > { %v1803_v16 = vmul.f32 0.70710677, %v1800_v14 }
 0x1d7   : > { %v887_v17 = vmul.f32 0.5, %v886_v15 }
 0x1d8   : > { %v942_v18 = vmul.f32 %v1803_v16, %v1803_v16 }
 0x1d9   : > { %v888_v19 = vsub.f32 1.5, %v887_v17 }
 0x1da   : > { %v1528_v20 = vpop.eup %1527  ;;  %v1807_v21 = vmin.f32 %v942_v18, 16.0 }
 0x1db   : > { %v889_v22 = vmul.f32 %v1526_v10, %v888_v19  ;;  %v895_v23 = vmul.f32 %v1528_v20, %v869_v12  ;;  %vm901_vm7 = vweird.f32 %v1528_v20 }
 0x1dc   : > { %v944_v24 = vmul.f32 2.1237322e-06, %v1807_v21  ;;  %v955_v25 = vmul.f32 3.8918573e-05, %v1807_v21  ;;  %vm902_vm9 = vmor %vm900_vm8, %vm901_vm7 }
 0x1dd   : > { %v893_v26 = vsel %vm892_vm6, %v1526_v10, %v889_v22  ;;  %v896_v27 = vmul.f32 %v1528_v20, %v895_v23 }
 0x1de   : > { %v945_v28 = vadd.f32 0.00028619796, %v944_v24  ;;  %v956_v29 = vadd.f32 0.001143296, %v955_v25  ;;  %v915_v30 = vmul.f32 %v893_v26, %v838_v51 }
 0x1df   : > { %v897_v31 = vmul.f32 0.5, %v896_v27  ;;  %v871_v32 = vpop.f32.mrf.mxu3 }
 0x1e0   : > { %v946_v33 = vmul.f32 %v945_v28, %v1807_v21  ;;  %v957_v34 = vmul.f32 %v956_v29, %v1807_v21  ;;  %v923_v35 = vmul.f32 %v1791_v5, %v915_v30  ;;  %v872_v36 = vadd.f32 1e-05, %v871_v32 }
 0x1e1   : > { %v898_v37 = vsub.f32 1.5, %v897_v31 }
 0x1e2   : > { %v947_v38 = vadd.f32 0.0036580483, %v946_v33  ;;  %v958_v39 = vadd.f32 0.014752088, %v957_v34  ;;  %v1815_v40 = vadd.f32 %v1796_v8, %v923_v35  ;;  %1529 = vrsqrt.f32 %v872_v36 }
 0x1e3   : > { %v899_v41 = vmul.f32 %v1528_v20, %v898_v37  ;;  %vm910_vm11 = vweird.f32 %v872_v36 }
 0x1e4   : > { %v948_v42 = vmul.f32 %v947_v38, %v1807_v21  ;;  %v959_v43 = vmul.f32 %v958_v39, %v1807_v21  ;;  %v1820_v44 = vmul.f32 0.70710677, %v1815_v40 }
 0x1e5   : > { %v903_v45 = vsel %vm902_vm9, %v1528_v20, %v899_v41 }
 0x1e6   : > { %v960_v46 = vadd.f32 0.112945676, %v959_v43  ;;  %v982_v47 = vmul.f32 %v1820_v44, %v1820_v44  ;;  %v916_v48 = vmul.f32 %v903_v45, %v1780_v54  ;;  %v949_v50 = vadd.f32 0.05243302, %v948_v42 }
 0x1e8   : > { %v1530_v49 = vpop.eup %1529  ;;  %v961_v51 = vmul.f32 %v960_v46, %v1807_v21  ;;  %v1826_v52 = vmin.f32 %v982_v47, 16.0  ;;  %v924_v53 = vmul.f32 %v1791_v5, %v916_v48  ;;  %v950_v54 = vmul.f32 %v949_v50, %v1807_v21 }
 0x1e9   : > { %v905_v55 = vmul.f32 %v1530_v49, %v872_v36  ;;  %vm911_vm10 = vweird.f32 %v1530_v49 }
 0x1ea   : > { %v962_v56 = vadd.f32 0.4994258, %v961_v51  ;;  %v984_v58 = vmul.f32 2.1237322e-06, %v1826_v52  ;;  %v1831_v59 = vadd.f32 %v1796_v8, %v924_v53  ;;  %v995_v60 = vmul.f32 3.8918573e-05, %v1826_v52  ;;  %vm912_vm12 = vmor %vm910_vm11, %vm911_vm10 }
 0x1eb   : > { %v906_v61 = vmul.f32 %v1530_v49, %v905_v55  ;;  %v951_v10 = vadd.f32 0.18741608, %v950_v54 }
 0x1ec   : > { %v963_v62 = vmul.f32 %v962_v56, %v1807_v21  ;;  %v985_v63 = vadd.f32 0.00028619796, %v984_v58  ;;  %v996_v0 = vadd.f32 0.001143296, %v995_v60  ;;  %v1837_v1 = vmul.f32 0.70710677, %v1831_v59 }
 0x1ed   : > { %v907_v2 = vmul.f32 0.5, %v906_v61  ;;  %v952_v19 = vmul.f32 %v951_v10, %v1807_v21 }
 0x1ee   : > { %v964_v3 = vadd.f32 1.0, %v963_v62  ;;  %v986_v4 = vmul.f32 %v985_v63, %v1826_v52  ;;  %v997_v6 = vmul.f32 %v996_v0, %v1826_v52  ;;  %v1022_v7 = vmul.f32 %v1837_v1, %v1837_v1 }
 0x1ef   : > { %v908_v9 = vsub.f32 1.5, %v907_v2  ;;  %v953_v31 = vadd.f32 1.1283791, %v952_v19 }
 0x1f0   : > { %1531 = vrcp.f32 %v964_v3  ;;  %v987_v11 = vadd.f32 0.0036580483, %v986_v4  ;;  %v998_v12 = vadd.f32 0.014752088, %v997_v6  ;;  %v1843_v13 = vmin.f32 %v1022_v7, 16.0 }
 0x1f1   : > { %v909_v15 = vmul.f32 %v1530_v49, %v908_v9  ;;  %v976_v37 = vand.u32 2147483648, %v964_v3  ;;  %v974_v42 = vand.u32 2147483647, %v964_v3  ;;  %vm970_vm14 = vweird.f32 %v964_v3 }
 0x1f2   : > { %v999_v17 = vmul.f32 %v998_v12, %v1826_v52  ;;  %v1024_v18 = vmul.f32 2.1237322e-06, %v1843_v13  ;;  %v1035_v20 = vmul.f32 3.8918573e-05, %v1843_v13  ;;  %v988_v23 = vmul.f32 %v987_v11, %v1826_v52 }
 0x1f3   : > { %v913_v22 = vsel %vm912_vm12, %v1530_v49, %v909_v15  ;;  %v977_v49 = vor.u32 1.1754944e-38, %v976_v37  ;;  %v954_v53 = vmul.f32 %v953_v31, %v1803_v16  ;;  %vm975_vm0 = vcmp.eq.f32.partialorder %v974_v42, 8.507059e+37 }
 0x1f4   : > { %v1000_v24 = vadd.f32 0.112945676, %v999_v17  ;;  %v1025_v25 = vadd.f32 0.00028619796, %v1024_v18  ;;  %v917_v26 = vmul.f32 %v913_v22, %v1784_v57  ;;  %v1036_v28 = vadd.f32 0.001143296, %v1035_v20 }
 0x1f5   : > { %v989_v35 = vadd.f32 0.05243302, %v988_v23 }
 0x1f6   : > { %v1532_v27 = vpop.eup %1531  ;;  %v1001_v30 = vmul.f32 %v1000_v24, %v1826_v52  ;;  %v1026_v32 = vmul.f32 %v1025_v25, %v1843_v13  ;;  %v1037_v33 = vmul.f32 %v1036_v28, %v1843_v13  ;;  %v925_v21 = vmul.f32 %v1791_v5, %v917_v26 }
 0x1f7   : > { %v966_v29 = vmul.f32 %v1532_v27, %v964_v3  ;;  %vm971_vm13 = vweird.f32 %v1532_v27  ;;  %v990_v47 = vmul.f32 %v989_v35, %v1826_v52  ;;  %v934_v3 = vmul.f32 0.5, %v1800_v14 }
 0x1f8   : > { %v1002_v36 = vadd.f32 0.4994258, %v1001_v30  ;;  %v1027_v38 = vadd.f32 0.0036580483, %v1026_v32  ;;  %v1038_v39 = vadd.f32 0.014752088, %v1037_v33  ;;  %v1856_v57 = vadd.f32 %v1796_v8, %v925_v21  ;;  %vm972_vm15 = vmor %vm970_vm14, %vm971_vm13 }
 0x1f9   : > { %v967_v34 = vsub.f32 1.0, %v966_v29  ;;  %v991_v60 = vadd.f32 0.18741608, %v990_v47 }
 0x1fa   : > { %v1003_v43 = vmul.f32 %v1002_v36, %v1826_v52  ;;  %v1039_v45 = vmul.f32 %v1038_v39, %v1843_v13  ;;  %v1861_v46 = vmul.f32 0.70710677, %v1856_v57  ;;  %v1028_v8 = vmul.f32 %v1027_v38, %v1843_v13 }
 0x1fb   : > { %v968_v41 = vmul.f32 %v1532_v27, %v967_v34  ;;  %v992_v7 = vmul.f32 %v991_v60, %v1826_v52 }
 0x1fc   : > { %v1004_v48 = vadd.f32 1.0, %v1003_v43  ;;  %v1040_v50 = vadd.f32 0.112945676, %v1039_v45  ;;  %v1062_v51 = vmul.f32 %v1861_v46, %v1861_v46  ;;  %v1029_v62 = vadd.f32 0.05243302, %v1028_v8 }
 0x1fd   : > { %v969_v5 = vadd.f32 %v1532_v27, %v968_v41  ;;  %v993_v20 = vadd.f32 1.1283791, %v992_v7 }
 0x1fe   : > { %1533 = vrcp.f32 %v1004_v48  ;;  %v1041_v61 = vmul.f32 %v1040_v50, %v1843_v13  ;;  %v1869_v54 = vmin.f32 %v1062_v51, 16.0  ;;  %v1030_v12 = vmul.f32 %v1029_v62, %v1843_v13 }
 0x1ff   : > { %v973_v55 = vsel %vm972_vm15, %v1532_v27, %v969_v5  ;;  %v1014_v22 = vand.u32 2147483647, %v1004_v48  ;;  %v1016_v23 = vand.u32 2147483648, %v1004_v48  ;;  %vm1010_vm2 = vweird.f32 %v1004_v48 }
 0x200   : > { %v978_v56 = vsel %vm975_vm0, %v977_v49, %v973_v55  ;;  %v1042_v0 = vadd.f32 0.4994258, %v1041_v61  ;;  %v1064_v2 = vmul.f32 2.1237322e-06, %v1869_v54  ;;  %v1075_v16 = vmul.f32 3.8918573e-05, %v1869_v54 }
 0x201   : > { %v979_v58 = vmul.f32 %v978_v56, %v954_v53  ;;  %v1031_v25 = vadd.f32 0.18741608, %v1030_v12  ;;  %v994_v30 = vmul.f32 %v993_v20, %v1820_v44  ;;  %v1017_v31 = vor.u32 1.1754944e-38, %v1016_v23 }
 0x202   : > { %v1043_v9 = vmul.f32 %v1042_v0, %v1843_v13  ;;  %v1065_v10 = vadd.f32 0.00028619796, %v1064_v2  ;;  %v1076_v15 = vadd.f32 0.001143296, %v1075_v16  ;;  %vm1015_vm4 = vcmp.eq.f32.partialorder %v1014_v22, 8.507059e+37 }
 0x203   : > { %v1413_v63 = vclamps-f32 %v979_v58, 1.0  ;;  %v1032_v33 = vmul.f32 %v1031_v25, %v1843_v13  ;;  %v935_v44 = vmul.f32 0.5, %v1815_v40  ;;  %v936_v0 = vmul.f32 0.5, %v1831_v59 }
 0x204   : > { %v1534_v4 = vpop.eup %1533  ;;  %v1044_v17 = vadd.f32 1.0, %v1043_v9  ;;  %v1066_v19 = vmul.f32 %v1065_v10, %v1869_v54  ;;  %v1077_v52 = vmul.f32 %v1076_v15, %v1869_v54 }
 0x205   : > { %v1102_v6 = vadd.f32 1.0, %v1413_v63  ;;  %v1006_v11 = vmul.f32 %v1534_v4, %v1004_v48  ;;  %vm1011_vm1 = vweird.f32 %v1534_v4  ;;  %v1033_v42 = vadd.f32 1.1283791, %v1032_v33 }
 0x206   : > { %1535 = vrcp.f32 %v1044_v17  ;;  %v1078_v26 = vadd.f32 0.014752088, %v1077_v52  ;;  %v1067_v28 = vadd.f32 0.0036580483, %v1066_v19  ;;  %vm1012_vm3 = vmor %vm1010_vm2, %vm1011_vm1  ;;  %v1054_v45 = vand.u32 2147483647, %v1044_v17 }
 0x207   : > { %v1106_v14 = vmul.f32 %v1102_v6, %v934_v3  ;;  %v1007_v18 = vsub.f32 1.0, %v1006_v11  ;;  %v1056_v5 = vand.u32 2147483648, %v1044_v17  ;;  %vm1050_vm6 = vweird.f32 %v1044_v17 }
 0x208   : > { %v1079_v29 = vmul.f32 %v1078_v26, %v1869_v54  ;;  %v1068_v38 = vmul.f32 %v1067_v28, %v1869_v54  ;;  %v1034_v56 = vmul.f32 %v1033_v42, %v1837_v1  ;;  %vm1055_vm8 = vcmp.eq.f32.partialorder %v1054_v45, 8.507059e+37 }
 0x209   : > { %1110 = vst [vmem:[%s1880_s29] sm:$0xff] %v1106_v14  ;;  %v1008_v24 = vmul.f32 %v1534_v4, %v1007_v18  ;;  %v1057_v53 = vor.u32 1.1754944e-38, %v1056_v5  ;;  %v937_v19 = vmul.f32 0.5, %v1856_v57 }
 0x20a   : > { %v1080_v21 = vadd.f32 0.112945676, %v1079_v29  ;;  %v1069_v49 = vadd.f32 0.05243302, %v1068_v38 }
 0x20b   : > { %v1009_v27 = vadd.f32 %v1534_v4, %v1008_v24 }
 0x20c   : > { %v1536_v34 = vpop.eup %1535  ;;  %v1081_v39 = vmul.f32 %v1080_v21, %v1869_v54  ;;  %v1070_v58 = vmul.f32 %v1069_v49, %v1869_v54 }
 0x20d   : > { %v1013_v32 = vsel %vm1012_vm3, %v1534_v4, %v1009_v27  ;;  %v1046_v37 = vmul.f32 %v1536_v34, %v1044_v17  ;;  %vm1051_vm5 = vweird.f32 %v1536_v34 }
 0x20e   : > { %v1018_v35 = vsel %vm1015_vm4, %v1017_v31, %v1013_v32  ;;  %v1082_v47 = vadd.f32 0.4994258, %v1081_v39  ;;  %vm1052_vm7 = vmor %vm1050_vm6, %vm1051_vm5  ;;  %v1071_v63 = vadd.f32 0.18741608, %v1070_v58 }
 0x20f   : > { %v1019_v36 = vmul.f32 %v1018_v35, %v994_v30  ;;  %v1047_v43 = vsub.f32 1.0, %v1046_v37 }
 0x210   : > { %v1083_v8 = vmul.f32 %v1082_v47, %v1869_v54  ;;  %v1072_v4 = vmul.f32 %v1071_v63, %v1869_v54 }
 0x211   : > { %v1414_v41 = vclamps-f32 %v1019_v36, 1.0  ;;  %v1048_v13 = vmul.f32 %v1536_v34, %v1047_v43 }
 0x212   : > { %v1084_v55 = vadd.f32 1.0, %v1083_v8  ;;  %v1073_v9 = vadd.f32 1.1283791, %v1072_v4 }
 0x213   : > { %v1103_v48 = vadd.f32 1.0, %v1414_v41  ;;  %v1049_v51 = vadd.f32 %v1536_v34, %v1048_v13 }
 0x214   : > { %1537 = vrcp.f32 %v1084_v55  ;;  %v1096_v1 = vand.u32 2147483648, %v1084_v55  ;;  %v1094_v11 = vand.u32 2147483647, %v1084_v55  ;;  %vm1090_vm10 = vweird.f32 %v1084_v55 }
 0x215   : > { %v1107_v50 = vmul.f32 %v1103_v48, %v935_v44  ;;  %v1053_v40 = vsel %vm1052_vm7, %v1536_v34, %v1049_v51  ;;  %v1074_v59 = vmul.f32 %v1073_v9, %v1861_v46 }
 0x216   : > { %v1058_v60 = vsel %vm1055_vm8, %v1057_v53, %v1053_v40  ;;  %v1097_v15 = vor.u32 1.1754944e-38, %v1096_v1  ;;  %vm1095_vm12 = vcmp.eq.f32.partialorder %v1094_v11, 8.507059e+37 }
 0x217   : > { %1111 = vst [vmem:[%s1880_s29 + $0x8] sm:$0xff] %v1107_v50  ;;  %v1059_v61 = vmul.f32 %v1058_v60, %v1034_v56 }
 0x219   : > { %v1415_v62 = vclamps-f32 %v1059_v61, 1.0 }
 0x21a   : > { %v1538_v3 = vpop.eup %1537 }
 0x21b   : > { %v1104_v2 = vadd.f32 1.0, %v1415_v62  ;;  %v1086_v6 = vmul.f32 %v1538_v3, %v1084_v55  ;;  %vm1091_vm9 = vweird.f32 %v1538_v3 }
 0x21c   : > { %vm1092_vm11 = vmor %vm1090_vm10, %vm1091_vm9 }
 0x21d   : > { %v1108_v16 = vmul.f32 %v1104_v2, %v936_v0  ;;  %v1087_v7 = vsub.f32 1.0, %v1086_v6 }
 0x21f   : > { %1112 = vst [vmem:[%s1880_s29 + $0x10] sm:$0xff] %v1108_v16  ;;  %v1088_v10 = vmul.f32 %v1538_v3, %v1087_v7 }
 0x221   : > { %v1089_v12 = vadd.f32 %v1538_v3, %v1088_v10 }
 0x223   : > { %v1093_v14 = vsel %vm1092_vm11, %v1538_v3, %v1089_v12 }
 0x224   : > { %v1098_v17 = vsel %vm1095_vm12, %v1097_v15, %v1093_v14 }
 0x225   : > { %v1099_v18 = vmul.f32 %v1098_v17, %v1074_v59 }
 0x227   : > { %v1416_v54 = vclamps-f32 %v1099_v18, 1.0 }
 0x229   : > { %v1105_v52 = vadd.f32 1.0, %v1416_v54 }
 0x22b   : > { %v1109_v20 = vmul.f32 %v1105_v52, %v937_v19 }
 0x22d   : > { %1113 = vst [vmem:[%s1880_s29 + $0x18] sm:$0xff] %v1109_v20 }
 0x22e PF: > { %s17_s26 = sadd.s32 1, %s1561_s26   ;;  %s1919_s24 = smov %s1557_s25 }
 0x22f   : > { %p14_p5 = scmp.ge.s32.totalorder %s17_s26, 4   ;;  %s1920_s25 = smov %s1922_s27 }
 0x231   :  { %16 = sbr.rel (!%p14_p5) target bundleno = 2 (0x2), region = 84 }

</bundles_post_ra>
